<compile_context>
chip_gen: v6e
topology: v6e:2x2x1
jax: 0.10.0
libtpu: 0.0.40
codegen_flags: <defaults>
</compile_context>

<pallas_src>
import math

import jax
import jax.numpy as jnp
from jax import lax
from jax.experimental import pallas as pl
from jax.experimental.pallas import tpu as pltpu

_LANE = 128
_SMALL_N_XLA_THRESHOLD = 256          # below this, plain XLA beats any Pallas launch
_TILE_CANDIDATES = (2048, 1024, 512, 256, 128)


# ---------------------------------------------------------------------------
# VMEM-budget-aware tile selection (generation aware via get_tpu_info).
# ---------------------------------------------------------------------------
def _vmem_capacity_bytes():
    try:
        info = pltpu.get_tpu_info()
        cap = getattr(info, "vmem_capacity_bytes", None)
        if cap:
            return int(cap)
    except Exception:
        pass
    return 64 << 20  # conservative fallback: v7x has 64 MiB per TensorCore


def _double_buffered_bytes(tm, tn, d, channels, out_itemsize):
    in_bytes = 2 * (tm * d + tn * d) * 4            # f32 inputs, double-buffered
    out_bytes = 2 * channels * tm * tn * out_itemsize
    return in_bytes + out_bytes


def _select_tiles(n_pad, d, channels, out_itemsize, budget):
    """Pick (tm, tn).  Prefer a lane-dense tn == n_pad 1-D grid; keep at least
    two row blocks so the 'parallel' axis can shard across v7x's 2 TCs."""
    divisors = [t for t in _TILE_CANDIDATES if t <= n_pad and n_pad % t == 0]
    tm_cands = [t for t in divisors if t <= max(n_pad // 2, _LANE)] or [_LANE]
    # 1) lane-dense full-row blocks (tn == n_pad), largest tm that fits VMEM.
    for tm in tm_cands:
        if _double_buffered_bytes(tm, n_pad, d, channels, out_itemsize) <= budget:
            return tm, n_pad
    # 2) 2-D grid fallback: shrink tn, then tm.
    for tn in divisors:
        for tm in tm_cands:
            if _double_buffered_bytes(tm, tn, d, channels, out_itemsize) <= budget:
                return tm, tn
    return _LANE, _LANE


# ---------------------------------------------------------------------------
# Kernels (rows are pre-normalized in the wrapper, so this is just a matmul).
# ---------------------------------------------------------------------------
def _cosine_kernel(nvn_i_ref, nvn_j_ref, out_ref):
    cos = lax.dot_general(
        nvn_i_ref[...], nvn_j_ref[...],
        dimension_numbers=(((1,), (1,)), ((), ())),   # contract last dim of both
        preferred_element_type=jnp.float32)            # (TM, TN) f32 on the MXU
    out_ref[...] = cos.astype(out_ref.dtype)


def _cosine_gumbel_kernel(nvn_i_ref, nvn_j_ref, w_ref, b_ref, out_ref):
    cos = lax.dot_general(
        nvn_i_ref[...], nvn_j_ref[...],
        dimension_numbers=(((1,), (1,)), ((), ())),
        preferred_element_type=jnp.float32)
    # Hoist the tiny Linear(1, 2) scalars once per grid step (SMEM reads /
    # broadcasts are not CSE'd by JAX).
    w0 = w_ref[0]
    w1 = w_ref[1]
    b0 = b_ref[0]
    b1 = b_ref[1]
    # Channel-leading layout keeps both stores full-tile and lane-dense.
    out_ref[0] = (cos * w0 + b0).astype(out_ref.dtype)
    out_ref[1] = (cos * w1 + b1).astype(out_ref.dtype)


# ---------------------------------------------------------------------------
# Tiny-N fallback: a fused XLA expression is strictly faster than any launch.
# ---------------------------------------------------------------------------
def _xla_forward(nodevec, gumbel_w, gumbel_b, gumbel, channel_last, out_dtype):
    nv = nodevec.astype(jnp.float32)
    rel = nv @ nv.T
    norms = jnp.sqrt(jnp.sum(nv * nv, axis=-1))
    cos = rel / (norms[:, None] * norms[None, :])
    if not gumbel:
        return cos.astype(out_dtype)
    w = jnp.asarray(gumbel_w, jnp.float32).reshape(2)
    b = jnp.asarray(gumbel_b, jnp.float32).reshape(2)
    if channel_last:
        out = cos[..., None] * w.reshape(1, 1, 2) + b.reshape(1, 1, 2)
    else:
        out = cos[None, :, :] * w.reshape(2, 1, 1) + b.reshape(2, 1, 1)
    return out.astype(out_dtype)


# ---------------------------------------------------------------------------
# Public wrapper.
# ---------------------------------------------------------------------------
def gdn_graph_learning(nodevec, gumbel_w=None, gumbel_b=None,
                       sampling="Gumbel_softmax", channel_last=False,
                       out_dtype=jnp.float32):
    """nodevec: (N, D) embedding table (the nn.Embedding weight; the arange(N)
    lookup in the reference forward is an identity gather).
    gumbel_w: (2, 1) Linear weight, gumbel_b: (2,) bias (Gumbel branch only).

    Returns:
      sampling != 'Gumbel_softmax' : (N, N) cosine matrix.
      sampling == 'Gumbel_softmax' : (2, N, N) lane-dense slab (default) or
                                     PyTorch's (N, N, 2) if channel_last=True.
    """
    n, d = nodevec.shape
    gumbel = sampling == "Gumbel_softmax"

    if n < _SMALL_N_XLA_THRESHOLD:
        return _xla_forward(nodevec, gumbel_w, gumbel_b, gumbel,
                            channel_last, out_dtype)

    # Hoist the normalization out of the kernel: one O(N*D) pass, then the
    # kernel is a pure matmul of unit rows.
    nv = nodevec.astype(jnp.float32)
    norms = jnp.sqrt(jnp.sum(nv * nv, axis=-1, keepdims=True))
    nvn = nv / norms

    # Pad N to a multiple of 128 (lane-dense, no masked partial stores); the
    # zero padding rows only produce zeros that are sliced off afterwards.
    n_pad = ((n + _LANE - 1) // _LANE) * _LANE
    if n_pad != n:
        nvn = jnp.pad(nvn, ((0, n_pad - n), (0, 0)))

    channels = 2 if gumbel else 1
    out_itemsize = jnp.dtype(out_dtype).itemsize
    cap = _vmem_capacity_bytes()
    budget = int(cap * 0.6)
    tm, tn = _select_tiles(n_pad, d, channels, out_itemsize, budget)
    needed = _double_buffered_bytes(tm, tn, d, channels, out_itemsize)
    vmem_limit = int(min(cap * 0.85, max(needed + (8 << 20), 32 << 20)))

    if tn == n_pad:
        # 1-D grid over row blocks; nv_j is the full (N, D) table (DMA'd once).
        grid = (n_pad // tm,)
        dim_sem = ("parallel",)
        nv_i_spec = pl.BlockSpec((tm, d), lambda i: (i, 0))
        nv_j_spec = pl.BlockSpec((tn, d), lambda i: (0, 0))
        out_map_2d = lambda i: (i, 0)
        out_map_3d = lambda i: (0, i, 0)
    else:
        grid = (n_pad // tm, n_pad // tn)
        dim_sem = ("parallel", "parallel")
        nv_i_spec = pl.BlockSpec((tm, d), lambda i, j: (i, 0))
        nv_j_spec = pl.BlockSpec((tn, d), lambda i, j: (j, 0))
        out_map_2d = lambda i, j: (i, j)
        out_map_3d = lambda i, j: (0, i, j)

    params = pltpu.CompilerParams(dimension_semantics=dim_sem,
                                  vmem_limit_bytes=vmem_limit)

    if not gumbel:
        out = pl.pallas_call(
            _cosine_kernel,
            out_shape=jax.ShapeDtypeStruct((n_pad, n_pad), out_dtype),
            grid=grid,
            in_specs=[nv_i_spec, nv_j_spec],
            out_specs=pl.BlockSpec((tm, tn), out_map_2d),
            compiler_params=params,
        )(nvn, nvn)
        return out[:n, :n] if n_pad != n else out

    # Tiny Linear(1, 2) params live in SMEM as flat f32[2] arrays.
    w_smem = jnp.asarray(gumbel_w, jnp.float32).reshape(2)
    b_smem = jnp.asarray(gumbel_b, jnp.float32).reshape(2)

    out = pl.pallas_call(
        _cosine_gumbel_kernel,
        out_shape=jax.ShapeDtypeStruct((2, n_pad, n_pad), out_dtype),
        grid=grid,
        in_specs=[
            nv_i_spec,
            nv_j_spec,
            pl.BlockSpec(memory_space=pltpu.MemorySpace.SMEM),
            pl.BlockSpec(memory_space=pltpu.MemorySpace.SMEM),
        ],
        out_specs=pl.BlockSpec((2, tm, tn), out_map_3d),
        compiler_params=params,
    )(nvn, nvn, w_smem, b_smem)

    if n_pad != n:
        out = out[:, :n, :n]
    if channel_last:
        # PyTorch gumbel_trick(outputs.unsqueeze(-1)) layout: (N, N, 2).
        # NOTE: lane-hostile + extra HBM round trip; prefer the (2, N, N) slab.
        return jnp.transpose(out, (1, 2, 0))
    return out


# ---------------------------------------------------------------------------
# Pure-JAX reference (mirrors the PyTorch forward) + init helpers.
# ---------------------------------------------------------------------------
def _reference(nodevec, gumbel_w=None, gumbel_b=None, sampling="Gumbel_softmax"):
    nv = nodevec.astype(jnp.float32)
    rel = nv @ nv.T
    norms = jnp.linalg.norm(nv, axis=-1)
    cos = rel / (norms[:, None] * norms[None, :])
    if sampling != "Gumbel_softmax":
        return cos
    return cos[..., None] * gumbel_w.reshape(1, 1, 2) + gumbel_b.reshape(1, 1, 2)


def _xavier_uniform(key, shape):
    fan_in, fan_out = shape[1], shape[0]
    bound = math.sqrt(6.0 / (fan_in + fan_out))
    return jax.random.uniform(key, shape, jnp.float32, -bound, bound)


if __name__ == "__main__":
    key = jax.random.PRNGKey(0)
    k_emb, k_w, k_b, k_big, k_rag = jax.random.split(key, 5)

    # ---- Shipped config: num_nodes=16, hidden_dim=32, sampling='Gumbel_softmax'
    #      -> tiny-N XLA fallback (Pallas launch would dominate at this size).
    num_nodes, hidden_dim = 16, 32
    embedding = _xavier_uniform(k_emb, (num_nodes, hidden_dim))        # nn.Embedding weight
    gumbel_w = _xavier_uniform(k_w, (2, 1))                            # nn.Linear(1, 2) weight
    gumbel_b = jax.random.uniform(k_b, (2,), jnp.float32, 0.0, 1.0)    # nn.Linear(1, 2) bias

    out = gdn_graph_learning(embedding, gumbel_w, gumbel_b,
                             sampling="Gumbel_softmax", channel_last=True)
    out = jax.block_until_ready(out)
    assert out.shape == (num_nodes, num_nodes, 2), out.shape
    ref = _reference(embedding, gumbel_w, gumbel_b, sampling="Gumbel_softmax")
    assert jnp.allclose(out, ref, atol=1e-4, rtol=1e-4)

    # Cosine-only branch (sampling != 'Gumbel_softmax').
    cos_out = jax.block_until_ready(
        gdn_graph_learning(embedding, sampling="cosine"))
    assert jnp.allclose(cos_out, _reference(embedding, sampling="cosine"),
                        atol=1e-4, rtol=1e-4)

    # ---- Tiled Pallas path: N=384 -> lane-dense tn=N, 1-D parallel grid of 3 row blocks.
    n_big, d_big = 384, 64
    emb_big = _xavier_uniform(k_big, (n_big, d_big))
    out_big = jax.block_until_ready(
        gdn_graph_learning(emb_big, gumbel_w, gumbel_b, sampling="Gumbel_softmax"))
    assert out_big.shape == (2, n_big, n_big), out_big.shape
    ref_big = _reference(emb_big, gumbel_w, gumbel_b, sampling="Gumbel_softmax")
    assert jnp.allclose(jnp.transpose(out_big, (1, 2, 0)), ref_big,
                        atol=1e-4, rtol=1e-4)

    # ---- Padding path: N=300 (not a multiple of 128) -> padded to 384, sliced back.
    n_rag = 300
    emb_rag = _xavier_uniform(k_rag, (n_rag, hidden_dim))
    cos_rag = jax.block_until_ready(gdn_graph_learning(emb_rag, sampling="cosine"))
    assert cos_rag.shape == (n_rag, n_rag), cos_rag.shape
    assert jnp.allclose(cos_rag, _reference(emb_rag, sampling="cosine"),
                        atol=1e-4, rtol=1e-4)

    print("KERNEL_OK")
</pallas_src>

<mosaic_0001>
module attributes {stable_mosaic.version = 11 : i64} {
  func.func @_cosine_gumbel_kernel(%arg0: i32, %arg1: memref<128x64xf32, #tpu.memory_space<vmem>>, %arg2: memref<384x64xf32, #tpu.memory_space<vmem>>, %arg3: memref<2xf32, #tpu.memory_space<smem>>, %arg4: memref<2xf32, #tpu.memory_space<smem>>, %arg5: memref<2x128x384xf32, #tpu.memory_space<vmem>>) attributes {dimension_semantics = [#tpu.dimension_semantics<parallel>], iteration_bounds = array<i64: 3>, scalar_prefetch = 0 : i64, scratch_operands = 0 : i64, tpu.core_type = #tpu.core_type<tc>, window_params = [{transform_indices = @transform_0, window_bounds = array<i64: 128, 64>}, {pipeline_mode = #tpu.pipeline_mode<synchronous>, transform_indices = @transform_1, window_bounds = array<i64: 384, 64>}, {transform_indices = @transform_2, window_bounds = array<i64: 2>}, {transform_indices = @transform_3, window_bounds = array<i64: 2>}, {transform_indices = @transform_4, window_bounds = array<i64: 2, 128, 384>}]} {
    %c0 = arith.constant 0 : index
    %c0_0 = arith.constant 0 : index
    %0 = vector.load %arg1[%c0, %c0_0] : memref<128x64xf32, #tpu.memory_space<vmem>>, vector<128x64xf32>
    %c0_1 = arith.constant 0 : index
    %c0_2 = arith.constant 0 : index
    %1 = vector.load %arg2[%c0_1, %c0_2] : memref<384x64xf32, #tpu.memory_space<vmem>>, vector<384x64xf32>
    %cst = arith.constant dense<0.000000e+00> : vector<128x384xf32>
    %2 = tpu.matmul %0, %1, %cst {dimension_numbers = #tpu.dot_dimension_numbers<[1], [1], [0], [0], [0, 0, 1, 0], [], []>} : vector<128x64xf32>, vector<384x64xf32>, vector<128x384xf32> -> vector<128x384xf32>
    %c0_3 = arith.constant 0 : index
    %3 = memref.load %arg3[%c0_3] : memref<2xf32, #tpu.memory_space<smem>>
    %c1 = arith.constant 1 : index
    %4 = memref.load %arg3[%c1] : memref<2xf32, #tpu.memory_space<smem>>
    %c0_4 = arith.constant 0 : index
    %5 = memref.load %arg4[%c0_4] : memref<2xf32, #tpu.memory_space<smem>>
    %c1_5 = arith.constant 1 : index
    %6 = memref.load %arg4[%c1_5] : memref<2xf32, #tpu.memory_space<smem>>
    %7 = vector.broadcast %3 : f32 to vector<128x384xf32>
    %8 = arith.mulf %2, %7 : vector<128x384xf32>
    %9 = vector.broadcast %5 : f32 to vector<128x384xf32>
    %10 = arith.addf %8, %9 : vector<128x384xf32>
    %c0_6 = arith.constant 0 : index
    %c0_7 = arith.constant 0 : index
    %c0_8 = arith.constant 0 : index
    %11 = vector.load %arg5[%c0_6, %c0_7, %c0_8] : memref<2x128x384xf32, #tpu.memory_space<vmem>>, vector<1x128x384xf32>
    %12 = vector.shape_cast %11 : vector<1x128x384xf32> to vector<128x384xf32>
    %13 = vector.shape_cast %10 : vector<128x384xf32> to vector<1x128x384xf32>
    tpu.vector_store %arg5[%c0_6, %c0_7, %c0_8], %13 {strides = array<i32>} : memref<2x128x384xf32, #tpu.memory_space<vmem>>, vector<1x128x384xf32>,
    %14 = vector.broadcast %4 : f32 to vector<128x384xf32>
    %15 = arith.mulf %2, %14 : vector<128x384xf32>
    %16 = vector.broadcast %6 : f32 to vector<128x384xf32>
    %17 = arith.addf %15, %16 : vector<128x384xf32>
    %c1_9 = arith.constant 1 : index
    %c0_10 = arith.constant 0 : index
    %c0_11 = arith.constant 0 : index
    %18 = vector.load %arg5[%c1_9, %c0_10, %c0_11] : memref<2x128x384xf32, #tpu.memory_space<vmem>>, vector<1x128x384xf32>
    %19 = vector.shape_cast %18 : vector<1x128x384xf32> to vector<128x384xf32>
    %20 = vector.shape_cast %17 : vector<128x384xf32> to vector<1x128x384xf32>
    tpu.vector_store %arg5[%c1_9, %c0_10, %c0_11], %20 {strides = array<i32>} : memref<2x128x384xf32, #tpu.memory_space<vmem>>, vector<1x128x384xf32>,
    return
  }
  func.func @transform_0(%arg0: i32) -> (i32, i32) {
    %c0_i32 = arith.constant 0 : i32
    %c0_i32_0 = arith.constant 0 : i32
    return %arg0, %c0_i32 : i32, i32
  }
  func.func @transform_1(%arg0: i32) -> (i32, i32) {
    %c0_i32 = arith.constant 0 : i32
    %c0_i32_0 = arith.constant 0 : i32
    %c0_i32_1 = arith.constant 0 : i32
    return %c0_i32, %c0_i32_0 : i32, i32
  }
  func.func @transform_2(%arg0: i32) -> i32 {
    %c0_i32 = arith.constant 0 : i32
    %c0_i32_0 = arith.constant 0 : i32
    return %c0_i32 : i32
  }
  func.func @transform_3(%arg0: i32) -> i32 {
    %c0_i32 = arith.constant 0 : i32
    %c0_i32_0 = arith.constant 0 : i32
    return %c0_i32 : i32
  }
  func.func @transform_4(%arg0: i32) -> (i32, i32, i32) {
    %c0_i32 = arith.constant 0 : i32
    %c0_i32_0 = arith.constant 0 : i32
    %c0_i32_1 = arith.constant 0 : i32
    return %c0_i32, %arg0, %c0_i32_0 : i32, i32, i32
  }
}

</mosaic_0001>

<bundles_post_ra>
// kernel: tpu_custom_call.1
= control target key start
LH: loop header
LB: loop body
LE: loop exit
PB: predicated region body
PF: predicated region fallthrough
CT: control target
= control target key end

     0   :  { %9 = vsyncpa [#allocation4], 0  ;;  %s2353_s0 = inlined_call_operand.vmem [shape: f32[384,64], index: 0, kind: input, shape index: {}]   ;;  %s2354_s1 = inlined_call_operand.vmem [shape: f32[384,64], index: 1, kind: input, shape index: {}]   ;;  %s2355_s2 = inlined_call_operand.hbm [shape: f32[2], index: 2, kind: input, shape index: {}]   ;;  %s2356_s3 = inlined_call_operand.hbm [shape: f32[2], index: 3, kind: input, shape index: {}]   ;;  %s2357_s4 = inlined_call_operand.hbm [shape: f32[2,384,384], index: 4, kind: output, shape index: {}]  }
   0x1   :  { %10 = vsyncpa [#allocation6], 0 }
   0x2   :  { %11 = vsyncpa [#allocation3], 0 }
   0x3   :  { %13 = vsyncpa [#allocation3 + $0x1], 0  ;;  %s1676_s15 = smov 0   ;;  %s1678_s16 = smov 0  }
   0x4   :  { %s1680_s17 = smov 0   ;;  %s1682_s18 = smov 0  }
   0x5 LB: > { %s1697_s19 = sadd.s32 4294967295, %s1640_s18   ;;  %s1204_s20 = sadd.s32 4294967294, %s1640_s18   ;;  %s1640_s18 = sphi %s1682_s18, %s2363_s18   ;;  %s1636_s17 = sphi %s1680_s17, %s2362_s17   ;;  %s1632_s16 = sphi %s1678_s16, %s2361_s16   ;;  %s1628_s15 = sphi %s1676_s15, %s2360_s15  }
   0x6   : > { %s1701_s21 = sadd.s32 1, %s1640_s18   ;;  %s115_s22 = sadd.s32 1, %s1636_s17 }
   0x7   : > { %s112_s23 = ssub.s32 %s1640_s18, %s1701_s21  ;;  %p125_p0 = scmp.ne.s32.totalorder %s1636_s17, %s1632_s16 }
   0x8   : > { %p113_p1 = scmp.eq.s32.totalorder %s112_s23, 0  ;;  %p126_p2 = scmp.eq.s32.totalorder %s1697_s19, 2 }
   0x9   : > { %p131_p3 = scmp.ne.s32.totalorder %s1632_s16, %s1628_s15  ;;  %p132_p4 = scmp.eq.s32.totalorder %s1204_s20, 2 }
   0xa   : > { %s1712_s24 = scalar_select %p113_p1, %s1636_s17, %s115_s22  }
   0xb   : > { %p1714_p5 = por %p126_p2, %p125_p0  ;;  %p1718_p6 = por %p132_p4, %p131_p3 }
   0xc   : > { %p1205_p7 = scmp.ge.s32.totalorder %s1640_s18, 1  ;;  %p139_p8 = scmp.lt.s32.totalorder %s1640_s18, 4 }
   0xd   : > { %p1530_p10 = scmp.eq.s32.totalorder %s1697_s19, 0  ;;  %s1642_s27 = smov [#allocation2]  }
   0xe   : > { %p140_p9 = pnand %p1205_p7, %p139_p8  ;;  %s1643_s30 = smov [#allocation5]  }
  0x10   : > { %p1519_p11 = pneg %p140_p9 }
  0x11   : > { %184 = sbr.rel (%p140_p9) target bundleno = 361 (0x169), region = 36 }
  0x12   : > { %p1520_p12 = pnand %p1530_p10, %p1519_p11 }
  0x14   : > { %1522 = dma.hbm_to_smem (!%p1520_p12), %s2355_s2, 16, %s1642_s27, [#allocation4]  }
  0x15   : > { %1525 = dma.hbm_to_smem (!%p1520_p12), %s2356_s3, 16, %s1643_s30, [#allocation6]  }
  0x16   : > { %1615 = dma.done.wait (%p1530_p10), [#allocation4], 16  }
  0x17   : > { %1617 = vsyncadd (%p1530_p10), [#allocation4], 4294967280 }
  0x18   : > { %1619 = dma.done.wait (%p1530_p10), [#allocation6], 16  }
  0x19   : > { %1621 = vsyncadd (%p1530_p10), [#allocation6], 4294967280 }
  0x1a   : > { %194 = sfence }
  0x1b   : > { %v269_v0 = vld [vmem:[%s2354_s1 + $0xf8] sm:$0xff]  ;;  %vm286_vm0 = vcmask 523264   ;;  %v268_v2 = vld [vmem:[%s2354_s1 + $0xf0] sm:$0xff]  ;;  %s1212_s13 = sshll.u32 %s1697_s19, 4  ;;  %v267_v4 = vld [vmem:[%s2354_s1 + $0xe8] sm:$0xff]  ;;  %s785_s10 = sld [smem:[#allocation2]] }
  0x1c   : > { %v253_v1 = vld [vmem:[%s2354_s1 + $0x78] sm:$0xff]  ;;  %1349 = vmatprep.subr.msk.mxu0 %vm286_vm0, %v269_v0  ;;  %p216_p13 = scmp.lt.s32.totalorder %s1212_s13, 47  ;;  %v252_v3 = vld [vmem:[%s2354_s1 + $0x70] sm:$0xff]  ;;  %v251_v7 = vld [vmem:[%s2354_s1 + $0x68] sm:$0xff]  ;;  %s1294_s11 = sld [smem:[#allocation2 + $0x1]] }
  0x1d   : > { %1350 = vmatpush3.xpose.msk.msra.mxu0 %vm286_vm0, %v253_v1  ;;  %v285_v5 = vld [vmem:[%s2354_s1 + $0x178] sm:$0xff]  ;;  %v284_v6 = vld [vmem:[%s2354_s1 + $0x170] sm:$0xff]  ;;  %v266_v8 = vld [vmem:[%s2354_s1 + $0xe0] sm:$0xff]  ;;  %s787_s12 = sld [smem:[#allocation5]] }
  0x1e   : > { %1351 = vmatprep.subr.msk.mxu0 %vm286_vm0, %v268_v2  ;;  %s2365_s13 = smov (!%p216_p13, %s1212_s13), 47  ;;  %1445 = vmatprep.subr.msk.mxu1 %vm286_vm0, %v285_v5  ;;  %v283_v9 = vld [vmem:[%s2354_s1 + $0x168] sm:$0xff]  ;;  %v250_v10 = vld [vmem:[%s2354_s1 + $0x60] sm:$0xff]  ;;  %v265_v11 = vld [vmem:[%s2354_s1 + $0xd8] sm:$0xff]  ;;  %s1295_s14 = sld [smem:[#allocation5 + $0x1]] }
  0x1f   : > { %1446 = vmatpush3.xpose.msk.msra.mxu1 %vm286_vm0, %v285_v5  ;;  %s1213_s7 = sshll.u32 %s2365_s13, 3  ;;  %v282_v12 = vld [vmem:[%s2354_s1 + $0x160] sm:$0xff]  ;;  %v249_v14 = vld [vmem:[%s2354_s1 + $0x58] sm:$0xff]  ;;  %v264_v15 = vld [vmem:[%s2354_s1 + $0xd0] sm:$0xff] }
  0x20   : > { %1447 = vmatprep.subr.msk.mxu1 %vm286_vm0, %v284_v6  ;;  %s1774_s20 = scalar_lea.vmem %s2353_s0, %s1213_s7  ;;  %v281_v16 = vld [vmem:[%s2354_s1 + $0x158] sm:$0xff]  ;;  %v248_v17 = vld [vmem:[%s2354_s1 + $0x50] sm:$0xff]  ;;  %v263_v18 = vld [vmem:[%s2354_s1 + $0xc8] sm:$0xff] }
  0x21   : > { %1352 = vmatpush3.xpose.msk.msra.mxu0 %vm286_vm0, %v252_v3  ;;  %v1789_v13 = vld [vmem:[%s1774_s20] sm:$0xff]  ;;  %v280_v19 = vld [vmem:[%s2354_s1 + $0x150] sm:$0xff]  ;;  %v247_v20 = vld [vmem:[%s2354_s1 + $0x48] sm:$0xff]  ;;  %v2017_v0 = vstv %s785_s10 }
  0x22   : > { %1353 = vmatprep.subr.msk.mxu0 %vm286_vm0, %v267_v4  ;;  %1381 = vmatprep.mubr.msk.f32.mxu0 %vm286_vm0, %v1789_v13  ;;  %v262_v21 = vld [vmem:[%s2354_s1 + $0xc0] sm:$0xff]  ;;  %v279_v22 = vld [vmem:[%s2354_s1 + $0x148] sm:$0xff]  ;;  %v261_v24 = vld [vmem:[%s2354_s1 + $0xb8] sm:$0xff]  ;;  %v2019_v1 = vstv %s1294_s11 }
  0x23   : > { %1448 = vmatpush3.xpose.msk.msra.mxu1 %vm286_vm0, %v284_v6  ;;  %1477 = vmatprep.mubr.msk.f32.mxu1 %vm286_vm0, %v1789_v13  ;;  %v246_v23 = vld [vmem:[%s2354_s1 + $0x40] sm:$0xff]  ;;  %v245_v26 = vld [vmem:[%s2354_s1 + $0x38] sm:$0xff]  ;;  %v260_v27 = vld [vmem:[%s2354_s1 + $0xb0] sm:$0xff]  ;;  %v2021_v3 = vstv %s787_s12 }
  0x24   : > { %1449 = vmatprep.subr.msk.mxu1 %vm286_vm0, %v283_v9  ;;  %v278_v25 = vld [vmem:[%s2354_s1 + $0x140] sm:$0xff]  ;;  %v277_v28 = vld [vmem:[%s2354_s1 + $0x138] sm:$0xff]  ;;  %v244_v29 = vld [vmem:[%s2354_s1 + $0x30] sm:$0xff]  ;;  %v2023_v4 = vstv %s1295_s14 }
  0x25   : > { %1354 = vmatpush3.xpose.msk.msra.mxu0 %vm286_vm0, %v251_v7  ;;  %v259_v30 = vld [vmem:[%s2354_s1 + $0xa8] sm:$0xff]  ;;  %v276_v31 = vld [vmem:[%s2354_s1 + $0x130] sm:$0xff]  ;;  %v258_v33 = vld [vmem:[%s2354_s1 + $0xa0] sm:$0xff] }
  0x26   : > { %1355 = vmatprep.subr.msk.mxu0 %vm286_vm0, %v266_v8  ;;  %v243_v32 = vld [vmem:[%s2354_s1 + $0x28] sm:$0xff]  ;;  %v242_v35 = vld [vmem:[%s2354_s1 + $0x20] sm:$0xff]  ;;  %v257_v36 = vld [vmem:[%s2354_s1 + $0x98] sm:$0xff] }
  0x27   : > { %1450 = vmatpush3.xpose.msk.msra.mxu1 %vm286_vm0, %v283_v9  ;;  %v275_v34 = vld [vmem:[%s2354_s1 + $0x128] sm:$0xff]  ;;  %v274_v37 = vld [vmem:[%s2354_s1 + $0x120] sm:$0xff]  ;;  %v241_v38 = vld [vmem:[%s2354_s1 + $0x18] sm:$0xff] }
  0x28   : > { %1451 = vmatprep.subr.msk.mxu1 %vm286_vm0, %v282_v12  ;;  %v256_v39 = vld [vmem:[%s2354_s1 + $0x90] sm:$0xff]  ;;  %v273_v40 = vld [vmem:[%s2354_s1 + $0x118] sm:$0xff]  ;;  %v255_v42 = vld [vmem:[%s2354_s1 + $0x88] sm:$0xff] }
  0x29   : > { %1356 = vmatpush3.xpose.msk.msra.mxu0 %vm286_vm0, %v250_v10  ;;  %v240_v41 = vld [vmem:[%s2354_s1 + $0x10] sm:$0xff]  ;;  %v239_v44 = vld [vmem:[%s2354_s1 + $0x8] sm:$0xff]  ;;  %v254_v45 = vld [vmem:[%s2354_s1 + $0x80] sm:$0xff] }
  0x2a   : > { %1357 = vmatprep.subr.msk.mxu0 %vm286_vm0, %v265_v11  ;;  %v272_v43 = vld [vmem:[%s2354_s1 + $0x110] sm:$0xff]  ;;  %v271_v46 = vld [vmem:[%s2354_s1 + $0x108] sm:$0xff]  ;;  %v238_v47 = vld [vmem:[%s2354_s1] sm:$0xff] }
  0x2b   : > { %1452 = vmatpush3.xpose.msk.msra.mxu1 %vm286_vm0, %v282_v12  ;;  %v270_v48 = vld [vmem:[%s2354_s1 + $0x100] sm:$0xff]  ;;  %v223_v49 = vld [vmem:[%s1774_s20 + $0x8] sm:$0xff]  ;;  %v224_v50 = vld [vmem:[%s1774_s20 + $0x10] sm:$0xff] }
  0x2c   : > { %1453 = vmatprep.subr.msk.mxu1 %vm286_vm0, %v281_v16  ;;  %v225_v51 = vld [vmem:[%s1774_s20 + $0x18] sm:$0xff]  ;;  %v226_v52 = vld [vmem:[%s1774_s20 + $0x20] sm:$0xff]  ;;  %v227_v53 = vld [vmem:[%s1774_s20 + $0x28] sm:$0xff] }
  0x2d   : > { %1358 = vmatpush3.xpose.msk.msra.mxu0 %vm286_vm0, %v249_v14  ;;  %v228_v54 = vld [vmem:[%s1774_s20 + $0x30] sm:$0xff]  ;;  %v229_v55 = vld [vmem:[%s1774_s20 + $0x38] sm:$0xff]  ;;  %v230_v56 = vld [vmem:[%s1774_s20 + $0x40] sm:$0xff] }
  0x2e   : > { %1359 = vmatprep.subr.msk.mxu0 %vm286_vm0, %v264_v15  ;;  %v231_v57 = vld [vmem:[%s1774_s20 + $0x48] sm:$0xff]  ;;  %v232_v58 = vld [vmem:[%s1774_s20 + $0x50] sm:$0xff]  ;;  %v233_v59 = vld [vmem:[%s1774_s20 + $0x58] sm:$0xff] }
  0x2f   : > { %1454 = vmatpush3.xpose.msk.msra.mxu1 %vm286_vm0, %v281_v16  ;;  %v234_v60 = vld [vmem:[%s1774_s20 + $0x60] sm:$0xff]  ;;  %v235_v61 = vld [vmem:[%s1774_s20 + $0x68] sm:$0xff]  ;;  %v236_v62 = vld [vmem:[%s1774_s20 + $0x70] sm:$0xff] }
  0x30   : > { %1455 = vmatprep.subr.msk.mxu1 %vm286_vm0, %v280_v19  ;;  %v237_v63 = vld [vmem:[%s1774_s20 + $0x78] sm:$0xff]  ;;  %s212_s20 = sand.u32 1, %s1632_s16  }
  0x31   : > { %1360 = vmatpush3.xpose.msk.msra.mxu0 %vm286_vm0, %v248_v17  ;;  %s1501_s13 = smul.u32 768, %s212_s20  ;;  %s1083_s23 = scalar_lea.sflag [#allocation3], %s212_s20 }
  0x32   : > { %1361 = vmatprep.subr.msk.mxu0 %vm286_vm0, %v263_v18 }
  0x33   : > { %1456 = vmatpush3.xpose.msk.msra.mxu1 %vm286_vm0, %v280_v19  ;;  %s2031_s22 = scalar_lea.vmem [#allocation7], %s1501_s13 }
  0x34   : > { %1457 = vmatprep.subr.msk.mxu1 %vm286_vm0, %v279_v22 }
  0x35   : > { %1362 = vmatpush3.xpose.msk.msra.mxu0 %vm286_vm0, %v247_v20 }
  0x36   : > { %1363 = vmatprep.subr.msk.mxu0 %vm286_vm0, %v262_v21 }
  0x37   : > { %1458 = vmatpush3.xpose.msk.msra.mxu1 %vm286_vm0, %v279_v22 }
  0x38   : > { %1459 = vmatprep.subr.msk.mxu1 %vm286_vm0, %v278_v25 }
  0x39   : > { %1364 = vmatpush3.xpose.msk.msra.mxu0 %vm286_vm0, %v246_v23 }
  0x3a   : > { %1365 = vmatprep.subr.msk.mxu0 %vm286_vm0, %v261_v24 }
  0x3b   : > { %1460 = vmatpush3.xpose.msk.msra.mxu1 %vm286_vm0, %v278_v25 }
  0x3c   : > { %1461 = vmatprep.subr.msk.mxu1 %vm286_vm0, %v277_v28 }
  0x3d   : > { %1366 = vmatpush3.xpose.msk.msra.mxu0 %vm286_vm0, %v245_v26 }
  0x3e   : > { %1367 = vmatprep.subr.msk.mxu0 %vm286_vm0, %v260_v27 }
  0x3f   : > { %1462 = vmatpush3.xpose.msk.msra.mxu1 %vm286_vm0, %v277_v28 }
  0x40   : > { %1463 = vmatprep.subr.msk.mxu1 %vm286_vm0, %v276_v31 }
  0x41   : > { %1368 = vmatpush3.xpose.msk.msra.mxu0 %vm286_vm0, %v244_v29 }
  0x42   : > { %1369 = vmatprep.subr.msk.mxu0 %vm286_vm0, %v259_v30 }
  0x43   : > { %1464 = vmatpush3.xpose.msk.msra.mxu1 %vm286_vm0, %v276_v31 }
  0x44   : > { %1465 = vmatprep.subr.msk.mxu1 %vm286_vm0, %v275_v34 }
  0x45   : > { %1370 = vmatpush3.xpose.msk.msra.mxu0 %vm286_vm0, %v243_v32 }
  0x46   : > { %1371 = vmatprep.subr.msk.mxu0 %vm286_vm0, %v258_v33 }
  0x47   : > { %1466 = vmatpush3.xpose.msk.msra.mxu1 %vm286_vm0, %v275_v34 }
  0x48   : > { %1467 = vmatprep.subr.msk.mxu1 %vm286_vm0, %v274_v37 }
  0x49   : > { %1372 = vmatpush3.xpose.msk.msra.mxu0 %vm286_vm0, %v242_v35 }
  0x4a   : > { %1373 = vmatprep.subr.msk.mxu0 %vm286_vm0, %v257_v36 }
  0x4b   : > { %1468 = vmatpush3.xpose.msk.msra.mxu1 %vm286_vm0, %v274_v37 }
  0x4c   : > { %1469 = vmatprep.subr.msk.mxu1 %vm286_vm0, %v273_v40 }
  0x4d   : > { %1374 = vmatpush3.xpose.msk.msra.mxu0 %vm286_vm0, %v241_v38 }
  0x4e   : > { %1375 = vmatprep.subr.msk.mxu0 %vm286_vm0, %v256_v39 }
  0x4f   : > { %1470 = vmatpush3.xpose.msk.msra.mxu1 %vm286_vm0, %v273_v40 }
  0x50   : > { %1471 = vmatprep.subr.msk.mxu1 %vm286_vm0, %v272_v43 }
  0x51   : > { %1376 = vmatpush3.xpose.msk.msra.mxu0 %vm286_vm0, %v240_v41 }
  0x52   : > { %1377 = vmatprep.subr.msk.mxu0 %vm286_vm0, %v255_v42 }
  0x53   : > { %1472 = vmatpush3.xpose.msk.msra.mxu1 %vm286_vm0, %v272_v43 }
  0x54   : > { %1473 = vmatprep.subr.msk.mxu1 %vm286_vm0, %v271_v46 }
  0x55   : > { %1378 = vmatpush3.xpose.msk.msra.mxu0 %vm286_vm0, %v239_v44 }
  0x56   : > { %1379 = vmatprep.subr.msk.mxu0 %vm286_vm0, %v254_v45 }
  0x57   : > { %1474 = vmatpush3.xpose.msk.msra.mxu1 %vm286_vm0, %v271_v46 }
  0x58   : > { %1475 = vmatprep.subr.msk.mxu1 %vm286_vm0, %v270_v48 }
  0x59   : > { %1380 = vmatpush3.xpose.msk.msra.mxu0 %vm286_vm0, %v238_v47 }
  0x5b   : > { %1476 = vmatpush3.xpose.msk.msra.mxu1 %vm286_vm0, %v270_v48 }
  0x5c   : > { %1382 = vmatmul.mubr.msk.f32.vlgmr.msra.gmra.mxu0 %vm286_vm0, %v1789_v13 }
  0x5d   : > { %1383 = vmatprep.mubr.msk.f32.mxu0 %vm286_vm0, %v223_v49 }
  0x5e   : > { %1478 = vmatmul.mubr.msk.f32.vlgmr.msra.gmra.mxu1 %vm286_vm0, %v223_v49 }
  0x5f   : > { %1480 = vmatprep.mubr.msk.f32.mxu1 %vm286_vm0, %v224_v50 }
  0x60   : > { %1384 = vmatmul.mubr.msk.f32.gmra.mxu0 %vm286_vm0, %v223_v49 }
  0x61   : > { %1385 = vmatprep.mubr.msk.f32.mxu0 %vm286_vm0, %v224_v50 }
  0x62   : > { %1481 = vmatmul.mubr.msk.f32.gmra.mxu1 %vm286_vm0, %v225_v51 }
  0x63   : > { %1483 = vmatprep.mubr.msk.f32.mxu1 %vm286_vm0, %v226_v52 }
  0x64   : > { %1386 = vmatmul.mubr.msk.f32.gmra.mxu0 %vm286_vm0, %v224_v50 }
  0x65   : > { %1387 = vmatprep.mubr.msk.f32.mxu0 %vm286_vm0, %v225_v51 }
  0x66   : > { %1484 = vmatmul.mubr.msk.f32.gmra.mxu1 %vm286_vm0, %v227_v53 }
  0x67   : > { %1486 = vmatprep.mubr.msk.f32.mxu1 %vm286_vm0, %v228_v54 }
  0x68   : > { %1388 = vmatmul.mubr.msk.f32.gmra.mxu0 %vm286_vm0, %v225_v51 }
  0x69   : > { %1389 = vmatprep.mubr.msk.f32.mxu0 %vm286_vm0, %v226_v52 }
  0x6a   : > { %1487 = vmatmul.mubr.msk.f32.gmra.mxu1 %vm286_vm0, %v229_v55 }
  0x6b   : > { %1489 = vmatprep.mubr.msk.f32.mxu1 %vm286_vm0, %v230_v56 }
  0x6c   : > { %1390 = vmatmul.mubr.msk.f32.gmra.mxu0 %vm286_vm0, %v226_v52 }
  0x6d   : > { %1391 = vmatprep.mubr.msk.f32.mxu0 %vm286_vm0, %v227_v53 }
  0x6e   : > { %1490 = vmatmul.mubr.msk.f32.gmra.mxu1 %vm286_vm0, %v231_v57 }
  0x6f   : > { %1492 = vmatprep.mubr.msk.f32.mxu1 %vm286_vm0, %v232_v58 }
  0x70   : > { %1392 = vmatmul.mubr.msk.f32.gmra.mxu0 %vm286_vm0, %v227_v53 }
  0x71   : > { %1393 = vmatprep.mubr.msk.f32.mxu0 %vm286_vm0, %v228_v54 }
  0x72   : > { %1493 = vmatmul.mubr.msk.f32.gmra.mxu1 %vm286_vm0, %v233_v59 }
  0x73   : > { %1495 = vmatprep.mubr.msk.f32.mxu1 %vm286_vm0, %v234_v60 }
  0x74   : > { %1394 = vmatmul.mubr.msk.f32.gmra.mxu0 %vm286_vm0, %v228_v54 }
  0x75   : > { %1395 = vmatprep.mubr.msk.f32.mxu0 %vm286_vm0, %v229_v55 }
  0x76   : > { %1496 = vmatmul.mubr.msk.f32.gmra.mxu1 %vm286_vm0, %v235_v61 }
  0x77   : > { %1498 = vmatprep.mubr.msk.f32.mxu1 %vm286_vm0, %v236_v62 }
  0x78   : > { %1396 = vmatmul.mubr.msk.f32.gmra.mxu0 %vm286_vm0, %v229_v55 }
  0x79   : > { %1397 = vmatprep.mubr.msk.f32.mxu0 %vm286_vm0, %v230_v56 }
  0x7a   : > { %1499 = vmatmul.mubr.msk.f32.gmra.mxu1 %vm286_vm0, %v237_v63 }
  0x7c   : > { %1398 = vmatmul.mubr.msk.f32.gmra.mxu0 %vm286_vm0, %v230_v56 }
  0x7d   : > { %1399 = vmatprep.mubr.msk.f32.mxu0 %vm286_vm0, %v231_v57 }
  0x80   : > { %1400 = vmatmul.mubr.msk.f32.gmra.mxu0 %vm286_vm0, %v231_v57 }
  0x81   : > { %1401 = vmatprep.mubr.msk.f32.mxu0 %vm286_vm0, %v232_v58 }
  0x84   : > { %1402 = vmatmul.mubr.msk.f32.gmra.mxu0 %vm286_vm0, %v232_v58 }
  0x85   : > { %1403 = vmatprep.mubr.msk.f32.mxu0 %vm286_vm0, %v233_v59 }
  0x88   : > { %1404 = vmatmul.mubr.msk.f32.gmra.mxu0 %vm286_vm0, %v233_v59 }
  0x89   : > { %1405 = vmatprep.mubr.msk.f32.mxu0 %vm286_vm0, %v234_v60 }
  0x8c   : > { %1406 = vmatmul.mubr.msk.f32.gmra.mxu0 %vm286_vm0, %v234_v60 }
  0x8d   : > { %1407 = vmatprep.mubr.msk.f32.mxu0 %vm286_vm0, %v235_v61 }
  0x90   : > { %1408 = vmatmul.mubr.msk.f32.gmra.mxu0 %vm286_vm0, %v235_v61 }
  0x91   : > { %1409 = vmatprep.mubr.msk.f32.mxu0 %vm286_vm0, %v236_v62 }
  0x94   : > { %1410 = vmatmul.mubr.msk.f32.gmra.mxu0 %vm286_vm0, %v236_v62 }
  0x95   : > { %1411 = vmatprep.mubr.msk.f32.mxu0 %vm286_vm0, %v237_v63 }
  0x98   : > { %1412 = vmatmul.mubr.msk.f32.gmra.mxu0 %vm286_vm0, %v237_v63 }
 0x11c   : > { %v545_v2 = vpop.f32.mrf.mxu0 }
 0x11d   : > { %v790_v5 = vmul.f32 %v2017_v0, %v545_v2  ;;  %v936_v6 = vmul.f32 %v2019_v1, %v545_v2 }
 0x11e   : > { %v547_v7 = vpop.f32.mrf.mxu0  ;;  %v1479_v17 = vpop.f32.mrf.mxu1 }
 0x11f   : > { %v839_v8 = vadd.f32 %v2021_v3, %v790_v5  ;;  %v985_v9 = vadd.f32 %v2023_v4, %v936_v6  ;;  %v791_v10 = vmul.f32 %v2017_v0, %v547_v7  ;;  %v937_v11 = vmul.f32 %v2019_v1, %v547_v7 }
 0x120   : > { %v551_v12 = vpop.f32.mrf.mxu0  ;;  %v795_v19 = vmul.f32 %v1479_v17, %v2017_v0  ;;  %v941_v20 = vmul.f32 %v1479_v17, %v2019_v1  ;;  %v706_v25 = vpop.f32.mrf.mxu1 }
 0x121   : > { %887 = vst [vmem:[%s2031_s22] sm:$0xff] %v839_v8  ;;  %1296 = vst [vmem:[%s2031_s22 + $0x180] sm:$0xff] %v985_v9  ;;  %v840_v13 = vadd.f32 %v2021_v3, %v791_v10  ;;  %v986_v14 = vadd.f32 %v2023_v4, %v937_v11  ;;  %v793_v15 = vmul.f32 %v2017_v0, %v551_v12 }
 0x122   : > { %v939_v16 = vmul.f32 %v2019_v1, %v551_v12  ;;  %v553_v18 = vpop.f32.mrf.mxu0  ;;  %v844_v27 = vadd.f32 %v2021_v3, %v795_v19  ;;  %v990_v28 = vadd.f32 %v2023_v4, %v941_v20  ;;  %v792_v29 = vmul.f32 %v2017_v0, %v706_v25  ;;  %v1482_v35 = vpop.f32.mrf.mxu1 }
 0x123   : > { %888 = vst [vmem:[%s2031_s22 + $0x8] sm:$0xff] %v840_v13  ;;  %1297 = vst [vmem:[%s2031_s22 + $0x188] sm:$0xff] %v986_v14  ;;  %v842_v21 = vadd.f32 %v2021_v3, %v793_v15  ;;  %v794_v23 = vmul.f32 %v2017_v0, %v553_v18  ;;  %v940_v24 = vmul.f32 %v2019_v1, %v553_v18 }
 0x124   : > { %v988_v22 = vadd.f32 %v2023_v4, %v939_v16  ;;  %v557_v26 = vpop.f32.mrf.mxu0  ;;  %v938_v30 = vmul.f32 %v2019_v1, %v706_v25  ;;  %892 = vst [vmem:[%s2031_s22 + $0x28] sm:$0xff] %v844_v27  ;;  %1301 = vst [vmem:[%s2031_s22 + $0x1a8] sm:$0xff] %v990_v28  ;;  %v841_v37 = vadd.f32 %v2021_v3, %v792_v29  ;;  %v716_v45 = vpop.f32.mrf.mxu1 }
 0x125   : > { %890 = vst [vmem:[%s2031_s22 + $0x18] sm:$0xff] %v842_v21  ;;  %v843_v31 = vadd.f32 %v2021_v3, %v794_v23  ;;  %v989_v32 = vadd.f32 %v2023_v4, %v940_v24  ;;  %v796_v33 = vmul.f32 %v2017_v0, %v557_v26  ;;  %v942_v34 = vmul.f32 %v2019_v1, %v557_v26 }
 0x126   : > { %1299 = vst [vmem:[%s2031_s22 + $0x198] sm:$0xff] %v988_v22  ;;  %v559_v36 = vpop.f32.mrf.mxu0  ;;  %v987_v38 = vadd.f32 %v2023_v4, %v938_v30  ;;  %v801_v39 = vmul.f32 %v1482_v35, %v2017_v0  ;;  %v947_v40 = vmul.f32 %v1482_v35, %v2019_v1  ;;  %889 = vst [vmem:[%s2031_s22 + $0x10] sm:$0xff] %v841_v37  ;;  %v1485_v55 = vpop.f32.mrf.mxu1 }
 0x127   : > { %891 = vst [vmem:[%s2031_s22 + $0x20] sm:$0xff] %v843_v31  ;;  %1300 = vst [vmem:[%s2031_s22 + $0x1a0] sm:$0xff] %v989_v32  ;;  %v845_v41 = vadd.f32 %v2021_v3, %v796_v33  ;;  %v991_v42 = vadd.f32 %v2023_v4, %v942_v34  ;;  %v797_v43 = vmul.f32 %v2017_v0, %v559_v36 }
 0x128   : > { %v943_v44 = vmul.f32 %v2019_v1, %v559_v36  ;;  %v563_v46 = vpop.f32.mrf.mxu0  ;;  %1298 = vst [vmem:[%s2031_s22 + $0x190] sm:$0xff] %v987_v38  ;;  %v850_v47 = vadd.f32 %v2021_v3, %v801_v39  ;;  %v996_v48 = vadd.f32 %v2023_v4, %v947_v40  ;;  %v798_v49 = vmul.f32 %v2017_v0, %v716_v45  ;;  %v726_v5 = vpop.f32.mrf.mxu1 }
 0x129   : > { %v944_v50 = vmul.f32 %v2019_v1, %v716_v45  ;;  %893 = vst [vmem:[%s2031_s22 + $0x30] sm:$0xff] %v845_v41  ;;  %1302 = vst [vmem:[%s2031_s22 + $0x1b0] sm:$0xff] %v991_v42  ;;  %v846_v51 = vadd.f32 %v2021_v3, %v797_v43  ;;  %v799_v53 = vmul.f32 %v2017_v0, %v563_v46 }
 0x12a   : > { %v992_v52 = vadd.f32 %v2023_v4, %v943_v44  ;;  %v945_v54 = vmul.f32 %v2019_v1, %v563_v46  ;;  %v565_v56 = vpop.f32.mrf.mxu0  ;;  %898 = vst [vmem:[%s2031_s22 + $0x58] sm:$0xff] %v850_v47  ;;  %1307 = vst [vmem:[%s2031_s22 + $0x1d8] sm:$0xff] %v996_v48  ;;  %v847_v57 = vadd.f32 %v2021_v3, %v798_v49  ;;  %v1488_v15 = vpop.f32.mrf.mxu1 }
 0x12b   : > { %v993_v58 = vadd.f32 %v2023_v4, %v944_v50  ;;  %v807_v59 = vmul.f32 %v1485_v55, %v2017_v0  ;;  %v953_v60 = vmul.f32 %v1485_v55, %v2019_v1  ;;  %894 = vst [vmem:[%s2031_s22 + $0x38] sm:$0xff] %v846_v51  ;;  %v848_v61 = vadd.f32 %v2021_v3, %v799_v53 }
 0x12c   : > { %1303 = vst [vmem:[%s2031_s22 + $0x1b8] sm:$0xff] %v992_v52  ;;  %v994_v62 = vadd.f32 %v2023_v4, %v945_v54  ;;  %v800_v63 = vmul.f32 %v2017_v0, %v565_v56  ;;  %v946_v2 = vmul.f32 %v2019_v1, %v565_v56  ;;  %v569_v6 = vpop.f32.mrf.mxu0  ;;  %895 = vst [vmem:[%s2031_s22 + $0x40] sm:$0xff] %v847_v57  ;;  %v736_v25 = vpop.f32.mrf.mxu1 }
 0x12d   : > { %1304 = vst [vmem:[%s2031_s22 + $0x1c0] sm:$0xff] %v993_v58  ;;  %v856_v7 = vadd.f32 %v2021_v3, %v807_v59  ;;  %v1002_v8 = vadd.f32 %v2023_v4, %v953_v60  ;;  %v804_v9 = vmul.f32 %v2017_v0, %v726_v5  ;;  %v950_v10 = vmul.f32 %v2019_v1, %v726_v5 }
 0x12e   : > { %896 = vst [vmem:[%s2031_s22 + $0x48] sm:$0xff] %v848_v61  ;;  %1305 = vst [vmem:[%s2031_s22 + $0x1c8] sm:$0xff] %v994_v62  ;;  %v849_v11 = vadd.f32 %v2021_v3, %v800_v63  ;;  %v995_v12 = vadd.f32 %v2023_v4, %v946_v2  ;;  %v802_v13 = vmul.f32 %v2017_v0, %v569_v6  ;;  %v571_v16 = vpop.f32.mrf.mxu0  ;;  %v1491_v35 = vpop.f32.mrf.mxu1 }
 0x12f   : > { %v948_v14 = vmul.f32 %v2019_v1, %v569_v6  ;;  %904 = vst [vmem:[%s2031_s22 + $0x88] sm:$0xff] %v856_v7  ;;  %1313 = vst [vmem:[%s2031_s22 + $0x208] sm:$0xff] %v1002_v8  ;;  %v853_v17 = vadd.f32 %v2021_v3, %v804_v9  ;;  %v999_v18 = vadd.f32 %v2023_v4, %v950_v10 }
 0x130   : > { %v813_v19 = vmul.f32 %v1488_v15, %v2017_v0  ;;  %v959_v20 = vmul.f32 %v1488_v15, %v2019_v1  ;;  %897 = vst [vmem:[%s2031_s22 + $0x50] sm:$0xff] %v849_v11  ;;  %1306 = vst [vmem:[%s2031_s22 + $0x1d0] sm:$0xff] %v995_v12  ;;  %v851_v21 = vadd.f32 %v2021_v3, %v802_v13  ;;  %v575_v26 = vpop.f32.mrf.mxu0  ;;  %v746_v45 = vpop.f32.mrf.mxu1 }
 0x131   : > { %v997_v22 = vadd.f32 %v2023_v4, %v948_v14  ;;  %v803_v23 = vmul.f32 %v2017_v0, %v571_v16  ;;  %v949_v24 = vmul.f32 %v2019_v1, %v571_v16  ;;  %901 = vst [vmem:[%s2031_s22 + $0x70] sm:$0xff] %v853_v17  ;;  %1310 = vst [vmem:[%s2031_s22 + $0x1f0] sm:$0xff] %v999_v18 }
 0x132   : > { %v862_v27 = vadd.f32 %v2021_v3, %v813_v19  ;;  %v1008_v28 = vadd.f32 %v2023_v4, %v959_v20  ;;  %v810_v29 = vmul.f32 %v2017_v0, %v736_v25  ;;  %v956_v30 = vmul.f32 %v2019_v1, %v736_v25  ;;  %899 = vst [vmem:[%s2031_s22 + $0x60] sm:$0xff] %v851_v21  ;;  %v577_v36 = vpop.f32.mrf.mxu0  ;;  %v1494_v55 = vpop.f32.mrf.mxu1 }
 0x133   : > { %1308 = vst [vmem:[%s2031_s22 + $0x1e0] sm:$0xff] %v997_v22  ;;  %v852_v31 = vadd.f32 %v2021_v3, %v803_v23  ;;  %v998_v32 = vadd.f32 %v2023_v4, %v949_v24  ;;  %v805_v33 = vmul.f32 %v2017_v0, %v575_v26  ;;  %v951_v34 = vmul.f32 %v2019_v1, %v575_v26 }
 0x134   : > { %910 = vst [vmem:[%s2031_s22 + $0xb8] sm:$0xff] %v862_v27  ;;  %1319 = vst [vmem:[%s2031_s22 + $0x238] sm:$0xff] %v1008_v28  ;;  %v859_v37 = vadd.f32 %v2021_v3, %v810_v29  ;;  %v1005_v38 = vadd.f32 %v2023_v4, %v956_v30  ;;  %v819_v39 = vmul.f32 %v1491_v35, %v2017_v0  ;;  %v581_v46 = vpop.f32.mrf.mxu0  ;;  %v756_v5 = vpop.f32.mrf.mxu1 }
 0x135   : > { %v965_v40 = vmul.f32 %v1491_v35, %v2019_v1  ;;  %900 = vst [vmem:[%s2031_s22 + $0x68] sm:$0xff] %v852_v31  ;;  %1309 = vst [vmem:[%s2031_s22 + $0x1e8] sm:$0xff] %v998_v32  ;;  %v854_v41 = vadd.f32 %v2021_v3, %v805_v33  ;;  %v1000_v42 = vadd.f32 %v2023_v4, %v951_v34 }
 0x136   : > { %v806_v43 = vmul.f32 %v2017_v0, %v577_v36  ;;  %v952_v44 = vmul.f32 %v2019_v1, %v577_v36  ;;  %907 = vst [vmem:[%s2031_s22 + $0xa0] sm:$0xff] %v859_v37  ;;  %1316 = vst [vmem:[%s2031_s22 + $0x220] sm:$0xff] %v1005_v38  ;;  %v868_v47 = vadd.f32 %v2021_v3, %v819_v39  ;;  %v583_v56 = vpop.f32.mrf.mxu0  ;;  %v1497_v15 = vpop.f32.mrf.mxu1 }
 0x137   : > { %v1014_v48 = vadd.f32 %v2023_v4, %v965_v40  ;;  %v816_v49 = vmul.f32 %v2017_v0, %v746_v45  ;;  %v962_v50 = vmul.f32 %v2019_v1, %v746_v45  ;;  %902 = vst [vmem:[%s2031_s22 + $0x78] sm:$0xff] %v854_v41  ;;  %1311 = vst [vmem:[%s2031_s22 + $0x1f8] sm:$0xff] %v1000_v42 }
 0x138   : > { %v855_v51 = vadd.f32 %v2021_v3, %v806_v43  ;;  %v1001_v52 = vadd.f32 %v2023_v4, %v952_v44  ;;  %v808_v53 = vmul.f32 %v2017_v0, %v581_v46  ;;  %v954_v54 = vmul.f32 %v2019_v1, %v581_v46  ;;  %916 = vst [vmem:[%s2031_s22 + $0xe8] sm:$0xff] %v868_v47  ;;  %v587_v6 = vpop.f32.mrf.mxu0  ;;  %v766_v25 = vpop.f32.mrf.mxu1 }
 0x139   : > { %1325 = vst [vmem:[%s2031_s22 + $0x268] sm:$0xff] %v1014_v48  ;;  %v865_v57 = vadd.f32 %v2021_v3, %v816_v49  ;;  %v1011_v58 = vadd.f32 %v2023_v4, %v962_v50  ;;  %v825_v59 = vmul.f32 %v1494_v55, %v2017_v0  ;;  %v971_v60 = vmul.f32 %v1494_v55, %v2019_v1 }
 0x13a   : > { %903 = vst [vmem:[%s2031_s22 + $0x80] sm:$0xff] %v855_v51  ;;  %1312 = vst [vmem:[%s2031_s22 + $0x200] sm:$0xff] %v1001_v52  ;;  %v857_v61 = vadd.f32 %v2021_v3, %v808_v53  ;;  %v1003_v62 = vadd.f32 %v2023_v4, %v954_v54  ;;  %v809_v63 = vmul.f32 %v2017_v0, %v583_v56  ;;  %v589_v16 = vpop.f32.mrf.mxu0  ;;  %v1500_v35 = vpop.f32.mrf.mxu1 }
 0x13b   : > { %v955_v2 = vmul.f32 %v2019_v1, %v583_v56  ;;  %913 = vst [vmem:[%s2031_s22 + $0xd0] sm:$0xff] %v865_v57  ;;  %1322 = vst [vmem:[%s2031_s22 + $0x250] sm:$0xff] %v1011_v58  ;;  %v874_v7 = vadd.f32 %v2021_v3, %v825_v59  ;;  %v1020_v8 = vadd.f32 %v2023_v4, %v971_v60 }
 0x13c   : > { %v822_v9 = vmul.f32 %v2017_v0, %v756_v5  ;;  %v968_v10 = vmul.f32 %v2019_v1, %v756_v5  ;;  %905 = vst [vmem:[%s2031_s22 + $0x90] sm:$0xff] %v857_v61  ;;  %1314 = vst [vmem:[%s2031_s22 + $0x210] sm:$0xff] %v1003_v62  ;;  %v858_v11 = vadd.f32 %v2021_v3, %v809_v63  ;;  %v593_v26 = vpop.f32.mrf.mxu0  ;;  %v776_v45 = vpop.f32.mrf.mxu1 }
 0x13d   : > { %v1004_v12 = vadd.f32 %v2023_v4, %v955_v2  ;;  %v811_v13 = vmul.f32 %v2017_v0, %v587_v6  ;;  %v957_v14 = vmul.f32 %v2019_v1, %v587_v6  ;;  %922 = vst [vmem:[%s2031_s22 + $0x118] sm:$0xff] %v874_v7  ;;  %1331 = vst [vmem:[%s2031_s22 + $0x298] sm:$0xff] %v1020_v8 }
 0x13e   : > { %v871_v17 = vadd.f32 %v2021_v3, %v822_v9  ;;  %v1017_v18 = vadd.f32 %v2023_v4, %v968_v10  ;;  %v831_v19 = vmul.f32 %v1497_v15, %v2017_v0  ;;  %v977_v20 = vmul.f32 %v1497_v15, %v2019_v1  ;;  %906 = vst [vmem:[%s2031_s22 + $0x98] sm:$0xff] %v858_v11  ;;  %v595_v36 = vpop.f32.mrf.mxu0 }
 0x13f   : > { %1315 = vst [vmem:[%s2031_s22 + $0x218] sm:$0xff] %v1004_v12  ;;  %v860_v21 = vadd.f32 %v2021_v3, %v811_v13  ;;  %v1006_v22 = vadd.f32 %v2023_v4, %v957_v14  ;;  %v812_v23 = vmul.f32 %v2017_v0, %v589_v16  ;;  %v958_v24 = vmul.f32 %v2019_v1, %v589_v16 }
 0x140   : > { %919 = vst [vmem:[%s2031_s22 + $0x100] sm:$0xff] %v871_v17  ;;  %1328 = vst [vmem:[%s2031_s22 + $0x280] sm:$0xff] %v1017_v18  ;;  %v880_v27 = vadd.f32 %v2021_v3, %v831_v19  ;;  %v1026_v28 = vadd.f32 %v2023_v4, %v977_v20  ;;  %v828_v29 = vmul.f32 %v2017_v0, %v766_v25  ;;  %v599_v46 = vpop.f32.mrf.mxu0 }
 0x141   : > { %v974_v30 = vmul.f32 %v2019_v1, %v766_v25  ;;  %908 = vst [vmem:[%s2031_s22 + $0xa8] sm:$0xff] %v860_v21  ;;  %1317 = vst [vmem:[%s2031_s22 + $0x228] sm:$0xff] %v1006_v22  ;;  %v861_v31 = vadd.f32 %v2021_v3, %v812_v23  ;;  %v1007_v32 = vadd.f32 %v2023_v4, %v958_v24 }
 0x142   : > { %v814_v33 = vmul.f32 %v2017_v0, %v593_v26  ;;  %v960_v34 = vmul.f32 %v2019_v1, %v593_v26  ;;  %928 = vst [vmem:[%s2031_s22 + $0x148] sm:$0xff] %v880_v27  ;;  %1337 = vst [vmem:[%s2031_s22 + $0x2c8] sm:$0xff] %v1026_v28  ;;  %v877_v37 = vadd.f32 %v2021_v3, %v828_v29  ;;  %v601_v55 = vpop.f32.mrf.mxu0 }
 0x143   : > { %v1023_v38 = vadd.f32 %v2023_v4, %v974_v30  ;;  %v837_v39 = vmul.f32 %v1500_v35, %v2017_v0  ;;  %v983_v40 = vmul.f32 %v1500_v35, %v2019_v1  ;;  %909 = vst [vmem:[%s2031_s22 + $0xb0] sm:$0xff] %v861_v31  ;;  %1318 = vst [vmem:[%s2031_s22 + $0x230] sm:$0xff] %v1007_v32 }
 0x144   : > { %v863_v41 = vadd.f32 %v2021_v3, %v814_v33  ;;  %v1009_v42 = vadd.f32 %v2023_v4, %v960_v34  ;;  %v815_v43 = vmul.f32 %v2017_v0, %v595_v36  ;;  %v961_v44 = vmul.f32 %v2019_v1, %v595_v36  ;;  %925 = vst [vmem:[%s2031_s22 + $0x130] sm:$0xff] %v877_v37  ;;  %v605_v62 = vpop.f32.mrf.mxu0 }
 0x145   : > { %1334 = vst [vmem:[%s2031_s22 + $0x2b0] sm:$0xff] %v1023_v38  ;;  %v886_v47 = vadd.f32 %v2021_v3, %v837_v39  ;;  %v1032_v48 = vadd.f32 %v2023_v4, %v983_v40  ;;  %v834_v49 = vmul.f32 %v2017_v0, %v776_v45  ;;  %v980_v50 = vmul.f32 %v2019_v1, %v776_v45 }
 0x146   : > { %911 = vst [vmem:[%s2031_s22 + $0xc0] sm:$0xff] %v863_v41  ;;  %1320 = vst [vmem:[%s2031_s22 + $0x240] sm:$0xff] %v1009_v42  ;;  %v864_v51 = vadd.f32 %v2021_v3, %v815_v43  ;;  %v1010_v52 = vadd.f32 %v2023_v4, %v961_v44  ;;  %v817_v53 = vmul.f32 %v2017_v0, %v599_v46  ;;  %v607_v7 = vpop.f32.mrf.mxu0 }
 0x147   : > { %v963_v54 = vmul.f32 %v2019_v1, %v599_v46  ;;  %934 = vst [vmem:[%s2031_s22 + $0x178] sm:$0xff] %v886_v47  ;;  %1343 = vst [vmem:[%s2031_s22 + $0x2f8] sm:$0xff] %v1032_v48  ;;  %v883_v56 = vadd.f32 %v2021_v3, %v834_v49  ;;  %v1029_v57 = vadd.f32 %v2023_v4, %v980_v50 }
 0x148   : > { %912 = vst [vmem:[%s2031_s22 + $0xc8] sm:$0xff] %v864_v51  ;;  %1321 = vst [vmem:[%s2031_s22 + $0x248] sm:$0xff] %v1010_v52  ;;  %v866_v58 = vadd.f32 %v2021_v3, %v817_v53  ;;  %v818_v60 = vmul.f32 %v2017_v0, %v601_v55  ;;  %v964_v61 = vmul.f32 %v2019_v1, %v601_v55  ;;  %v611_v12 = vpop.f32.mrf.mxu0 }
 0x149   : > { %v1012_v59 = vadd.f32 %v2023_v4, %v963_v54  ;;  %931 = vst [vmem:[%s2031_s22 + $0x160] sm:$0xff] %v883_v56  ;;  %1340 = vst [vmem:[%s2031_s22 + $0x2e0] sm:$0xff] %v1029_v57  ;;  %v820_v5 = vmul.f32 %v2017_v0, %v605_v62  ;;  %v966_v6 = vmul.f32 %v2019_v1, %v605_v62 }
 0x14a   : > { %914 = vst [vmem:[%s2031_s22 + $0xd8] sm:$0xff] %v866_v58  ;;  %v867_v63 = vadd.f32 %v2021_v3, %v818_v60  ;;  %v1013_v2 = vadd.f32 %v2023_v4, %v964_v61  ;;  %v821_v10 = vmul.f32 %v2017_v0, %v607_v7  ;;  %v967_v11 = vmul.f32 %v2019_v1, %v607_v7  ;;  %v613_v17 = vpop.f32.mrf.mxu0 }
 0x14b   : > { %1323 = vst [vmem:[%s2031_s22 + $0x258] sm:$0xff] %v1012_v59  ;;  %v869_v8 = vadd.f32 %v2021_v3, %v820_v5  ;;  %v1015_v9 = vadd.f32 %v2023_v4, %v966_v6  ;;  %v823_v15 = vmul.f32 %v2017_v0, %v611_v12  ;;  %v969_v16 = vmul.f32 %v2019_v1, %v611_v12 }
 0x14c   : > { %915 = vst [vmem:[%s2031_s22 + $0xe0] sm:$0xff] %v867_v63  ;;  %1324 = vst [vmem:[%s2031_s22 + $0x260] sm:$0xff] %v1013_v2  ;;  %v870_v13 = vadd.f32 %v2021_v3, %v821_v10  ;;  %v1016_v14 = vadd.f32 %v2023_v4, %v967_v11  ;;  %v824_v20 = vmul.f32 %v2017_v0, %v613_v17  ;;  %v617_v22 = vpop.f32.mrf.mxu0 }
 0x14d   : > { %917 = vst [vmem:[%s2031_s22 + $0xf0] sm:$0xff] %v869_v8  ;;  %1326 = vst [vmem:[%s2031_s22 + $0x270] sm:$0xff] %v1015_v9  ;;  %v872_v18 = vadd.f32 %v2021_v3, %v823_v15  ;;  %v1018_v19 = vadd.f32 %v2023_v4, %v969_v16  ;;  %v970_v21 = vmul.f32 %v2019_v1, %v613_v17 }
 0x14e   : > { %918 = vst [vmem:[%s2031_s22 + $0xf8] sm:$0xff] %v870_v13  ;;  %1327 = vst [vmem:[%s2031_s22 + $0x278] sm:$0xff] %v1016_v14  ;;  %v873_v23 = vadd.f32 %v2021_v3, %v824_v20  ;;  %v826_v25 = vmul.f32 %v2017_v0, %v617_v22  ;;  %v972_v26 = vmul.f32 %v2019_v1, %v617_v22  ;;  %v619_v27 = vpop.f32.mrf.mxu0 }
 0x14f   : > { %920 = vst [vmem:[%s2031_s22 + $0x108] sm:$0xff] %v872_v18  ;;  %1329 = vst [vmem:[%s2031_s22 + $0x288] sm:$0xff] %v1018_v19  ;;  %v1019_v24 = vadd.f32 %v2023_v4, %v970_v21  ;;  %v827_v30 = vmul.f32 %v2017_v0, %v619_v27  ;;  %v973_v31 = vmul.f32 %v2019_v1, %v619_v27 }
 0x150   : > { %921 = vst [vmem:[%s2031_s22 + $0x110] sm:$0xff] %v873_v23  ;;  %v875_v28 = vadd.f32 %v2021_v3, %v826_v25  ;;  %v1021_v29 = vadd.f32 %v2023_v4, %v972_v26  ;;  %v623_v32 = vpop.f32.mrf.mxu0 }
 0x151   : > { %1330 = vst [vmem:[%s2031_s22 + $0x290] sm:$0xff] %v1019_v24  ;;  %v876_v33 = vadd.f32 %v2021_v3, %v827_v30  ;;  %v1022_v34 = vadd.f32 %v2023_v4, %v973_v31  ;;  %v829_v35 = vmul.f32 %v2017_v0, %v623_v32  ;;  %v975_v36 = vmul.f32 %v2019_v1, %v623_v32 }
 0x152   : > { %923 = vst [vmem:[%s2031_s22 + $0x120] sm:$0xff] %v875_v28  ;;  %1332 = vst [vmem:[%s2031_s22 + $0x2a0] sm:$0xff] %v1021_v29  ;;  %v625_v37 = vpop.f32.mrf.mxu0 }
 0x153   : > { %924 = vst [vmem:[%s2031_s22 + $0x128] sm:$0xff] %v876_v33  ;;  %1333 = vst [vmem:[%s2031_s22 + $0x2a8] sm:$0xff] %v1022_v34  ;;  %v878_v38 = vadd.f32 %v2021_v3, %v829_v35  ;;  %v1024_v39 = vadd.f32 %v2023_v4, %v975_v36  ;;  %v830_v40 = vmul.f32 %v2017_v0, %v625_v37 }
 0x154   : > { %v976_v41 = vmul.f32 %v2019_v1, %v625_v37  ;;  %v629_v42 = vpop.f32.mrf.mxu0 }
 0x155   : > { %926 = vst [vmem:[%s2031_s22 + $0x138] sm:$0xff] %v878_v38  ;;  %1335 = vst [vmem:[%s2031_s22 + $0x2b8] sm:$0xff] %v1024_v39  ;;  %v879_v43 = vadd.f32 %v2021_v3, %v830_v40  ;;  %v832_v45 = vmul.f32 %v2017_v0, %v629_v42  ;;  %v978_v46 = vmul.f32 %v2019_v1, %v629_v42 }
 0x156   : > { %v1025_v44 = vadd.f32 %v2023_v4, %v976_v41  ;;  %v631_v47 = vpop.f32.mrf.mxu0 }
 0x157   : > { %927 = vst [vmem:[%s2031_s22 + $0x140] sm:$0xff] %v879_v43  ;;  %v881_v48 = vadd.f32 %v2021_v3, %v832_v45  ;;  %v1027_v49 = vadd.f32 %v2023_v4, %v978_v46  ;;  %v833_v50 = vmul.f32 %v2017_v0, %v631_v47  ;;  %v979_v51 = vmul.f32 %v2019_v1, %v631_v47 }
 0x158   : > { %1336 = vst [vmem:[%s2031_s22 + $0x2c0] sm:$0xff] %v1025_v44  ;;  %v635_v52 = vpop.f32.mrf.mxu0 }
 0x159   : > { %929 = vst [vmem:[%s2031_s22 + $0x150] sm:$0xff] %v881_v48  ;;  %1338 = vst [vmem:[%s2031_s22 + $0x2d0] sm:$0xff] %v1027_v49  ;;  %v882_v53 = vadd.f32 %v2021_v3, %v833_v50  ;;  %v1028_v54 = vadd.f32 %v2023_v4, %v979_v51  ;;  %v835_v55 = vmul.f32 %v2017_v0, %v635_v52 }
 0x15a   : > { %v981_v56 = vmul.f32 %v2019_v1, %v635_v52  ;;  %v637_v57 = vpop.f32.mrf.mxu0 }
 0x15b   : > { %930 = vst [vmem:[%s2031_s22 + $0x158] sm:$0xff] %v882_v53  ;;  %1339 = vst [vmem:[%s2031_s22 + $0x2d8] sm:$0xff] %v1028_v54  ;;  %v884_v58 = vadd.f32 %v2021_v3, %v835_v55  ;;  %v836_v60 = vmul.f32 %v2017_v0, %v637_v57  ;;  %v982_v61 = vmul.f32 %v2019_v1, %v637_v57 }
 0x15c   : > { %v1030_v59 = vadd.f32 %v2023_v4, %v981_v56 }
 0x15d   : > { %932 = vst [vmem:[%s2031_s22 + $0x168] sm:$0xff] %v884_v58  ;;  %v885_v62 = vadd.f32 %v2021_v3, %v836_v60  ;;  %v1031_v63 = vadd.f32 %v2023_v4, %v982_v61 }
 0x15e   : > { %1341 = vst [vmem:[%s2031_s22 + $0x2e8] sm:$0xff] %v1030_v59 }
 0x15f   : > { %933 = vst [vmem:[%s2031_s22 + $0x170] sm:$0xff] %v885_v62  ;;  %1342 = vst [vmem:[%s2031_s22 + $0x2f0] sm:$0xff] %v1031_v63 }
 0x160   : > { %s1502_s27 = smul.u32 6144, %s1697_s19  ;;  %s1107_s28 = sshll.u32 %s2031_s22, 4  ;;  %s1108_s28 = int_to_ptr.vmem [resolvable:$true] %s1107_s28 }
 0x161   : > { %s1644_s6 = smov 6144   ;;  %s1645_s7 = smov 18432  }
 0x162   : > { %s1096_s5 = scalar_lea.hbm %s2357_s4, %s1502_s27  ;;  %1511 = sst [smem:[#allocation9]] (%p1714_p5), %s1644_s6 }
 0x163   : > { %1512 = sst [smem:[#allocation9 + $0x1]] (%p1714_p5), %s1645_s7  ;;  %s1646_s8 = smov 16  }
 0x164   : > { %1513 = sst [smem:[#allocation9 + $0x2]] (%p1714_p5), %s1646_s8  ;;  %s1647_s9 = smov 384  }
 0x165   : > { %1514 = sst [smem:[#allocation9 + $0x3]] (%p1714_p5), %s1647_s9  ;;  %s1648_s19 = smov 24  }
 0x166   : > { %1515 = sst [smem:[#allocation9 + $0x4]] (%p1714_p5), %s1647_s9  ;;  %s1649_s20 = smov 131072  }
 0x167   : > { %1516 = sst [smem:[#allocation9 + $0x5]] (%p1714_p5), %s1648_s19  ;;  %s1650_s10 = smov 0  }
 0x168   : > { %1517 = dma.general (%p1714_p5), %s1108_s28, 12288, %s1096_s5, %s1083_s23, %s1649_s20, [#allocation9], %s1650_s10, 0  }
 0x169 PF: > { %p1534_p0 = scmp.ge.s32.totalorder %s1640_s18, 2  ;;  %s1135_s11 = sand.u32 1, %s1628_s15  }
 0x16a   : > { %s1136_s12 = scalar_lea.sflag [#allocation3], %s1135_s11 }
 0x16b   : > { %p1527_p1 = pnand %p1534_p0, %p1718_p6 }
 0x16d   : > { %p1528_p2 = pneg %p1527_p1 }
 0x16f   : > { %1623 = dma.done.wait (%p1528_p2), %s1136_s12, 12288  }
 0x170   : > { %1625 = vsyncadd (%p1528_p2), %s1136_s12, 4294955008  ;;  %p16_p3 = scmp.ge.s32.totalorder %s1701_s21, 5   ;;  %s2360_s15 = smov %s1632_s16 }
 0x171   : > { %s2361_s16 = smov %s1636_s17  ;;  %s2362_s17 = smov %s1712_s24 }
 0x172   : > { %s2363_s18 = smov %s1701_s21  ;;  %18 = sbr.rel (!%p16_p3) target bundleno = 5 (0x5), region = 86 }
 0x177   :  { %1141 = vsyncpa [#allocation3], 1 }
 0x178   :  { %1143 = vsyncpa [#allocation3 + $0x1], 1 }
 0x179   :  { %1144 = vsyncpa [#allocation4], 1 }
 0x17a   :  { %1146 = vsyncpa [#allocation4 + $0x1], 1 }
 0x17b   :  { %1147 = vsyncpa [#allocation6], 1 }

</bundles_post_ra>
